<compile_context>
chip_gen: v6e
topology: v6e:2x2x1
jax: 0.10.0
libtpu: 0.0.40
codegen_flags: <defaults>
</compile_context>

<pallas_src>
import math

import jax
import jax.numpy as jnp
from jax.experimental import pallas as pl
from jax.experimental.pallas import tpu as pltpu


def _linear_kernel(x_ref, w_ref, b_ref, o_ref):
    # x_ref: (B_tile, D)   w_ref: (D, O)   b_ref: (1, O)   o_ref: (B_tile, O)
    acc = jnp.dot(x_ref[...], w_ref[...], preferred_element_type=jnp.float32)
    o_ref[...] = (acc + b_ref[...].astype(jnp.float32)).astype(o_ref.dtype)


def prepare_dqn_params(weight, bias):
    """One-time layout prep (do at init, NOT per forward call).

    weight: (outputs, D) as in nn.Linear.weight  ->  (D, outputs)
    bias:   (outputs,)                           ->  (1, outputs)
    """
    return weight.T, bias.reshape(1, -1)


def _sublane_multiple(dtype):
    # f32 -> 8, bf16 -> 16, int8/fp8 -> 32 sublanes per tile.
    return {4: 8, 2: 16, 1: 32}.get(jnp.dtype(dtype).itemsize, 8)


def dqn_forward(x, w_t, b_row, *, block_b=8192):
    """Pallas implementation of DQN.forward (single nn.Linear): x @ W^T + b.

    x:     (B, D) with D = V_p + V_t
    w_t:   (D, O) pre-transposed weight  (from prepare_dqn_params)
    b_row: (1, O) bias row               (from prepare_dqn_params)
    returns (B, O), same dtype as x.
    """
    B, D = x.shape
    O = w_t.shape[1]
    itemsize = jnp.dtype(x.dtype).itemsize
    sub = _sublane_multiple(x.dtype)

    # Large batch tiles amortize the ~0.35 us/grid-step overhead; cap at
    # ~ceil(B/2) so big batches still give >= 2 grid steps (v7x megacore).
    half = -(-B // 2)                     # cdiv(B, 2)
    half = -(-half // sub) * sub          # round up to sublane multiple
    B_tile = max(sub, min(block_b, half))
    B_pad = -(-B // B_tile) * B_tile

    x_p = x if B_pad == B else jnp.pad(x, ((0, B_pad - B), (0, 0)))

    out = pl.pallas_call(
        _linear_kernel,
        out_shape=jax.ShapeDtypeStruct((B_pad, O), x.dtype),
        grid=(B_pad // B_tile,),
        in_specs=[
            pl.BlockSpec((B_tile, D), lambda i: (i, 0)),  # x: tiled over batch
            pl.BlockSpec((D, O), lambda i: (0, 0)),       # weight: resident
            pl.BlockSpec((1, O), lambda i: (0, 0)),       # bias: resident
        ],
        out_specs=pl.BlockSpec((B_tile, O), lambda i: (i, 0)),
        compiler_params=pltpu.CompilerParams(
            dimension_semantics=("parallel",),
        ),
        cost_estimate=pl.CostEstimate(
            flops=2 * B_pad * D * O,
            transcendentals=0,
            bytes_accessed=(B_pad * D + D * O + O + B_pad * O) * itemsize,
        ),
    )(x_p, w_t, b_row)

    return out if B_pad == B else out[:B]


def init_dqn_params(key, V_p, V_t, outputs=1):
    """Deterministic init mirroring nn.Linear's default (uniform +/- 1/sqrt(fan_in))."""
    in_features = V_p + V_t
    k_w, k_b = jax.random.split(key)
    bound = 1.0 / math.sqrt(in_features)
    weight = jax.random.uniform(
        k_w, (outputs, in_features), jnp.float32, -bound, bound
    )
    bias = jax.random.uniform(k_b, (outputs,), jnp.float32, -bound, bound)
    return weight, bias


if __name__ == "__main__":
    # Module-consistent small shapes: V_p = 16, V_t = 16, outputs = 1.
    V_p, V_t, outputs = 16, 16, 1
    D = V_p + V_t

    key = jax.random.PRNGKey(0)
    k_x, k_x2, k_params = jax.random.split(key, 3)

    weight, bias = init_dqn_params(k_params, V_p, V_t, outputs)
    # One-time layout prep, hoisted out of the forward path.
    w_t, b_row = prepare_dqn_params(weight, bias)

    # Small batch (single grid step).
    x = jax.random.normal(k_x, (8, D), dtype=jnp.float32)
    action = jax.block_until_ready(dqn_forward(x, w_t, b_row))
    ref = x @ weight.T + bias[None, :]
    assert action.shape == (8, outputs)
    assert jnp.allclose(action, ref, atol=1e-5, rtol=1e-5)

    # Slightly larger batch: exercises batch padding + a 2-step parallel grid.
    x2 = jax.random.normal(k_x2, (100, D), dtype=jnp.float32)
    action2 = jax.block_until_ready(dqn_forward(x2, w_t, b_row))
    ref2 = x2 @ weight.T + bias[None, :]
    assert action2.shape == (100, outputs)
    assert jnp.allclose(action2, ref2, atol=1e-5, rtol=1e-5)

    print("KERNEL_OK")
</pallas_src>

<mosaic_0001>
module attributes {stable_mosaic.version = 11 : i64} {
  func.func @_linear_kernel(%arg0: i32, %arg1: memref<8x32xf32, #tpu.memory_space<vmem>>, %arg2: memref<32x1xf32, #tpu.memory_space<vmem>>, %arg3: memref<1x1xf32, #tpu.memory_space<vmem>>, %arg4: memref<8x1xf32, #tpu.memory_space<vmem>>) attributes {dimension_semantics = [#tpu.dimension_semantics<parallel>], iteration_bounds = array<i64: 1>, scalar_prefetch = 0 : i64, scratch_operands = 0 : i64, tpu.core_type = #tpu.core_type<tc>, window_params = [{transform_indices = @transform_0, window_bounds = array<i64: 8, 32>}, {pipeline_mode = #tpu.pipeline_mode<synchronous>, transform_indices = @transform_1, window_bounds = array<i64: 32, 1>}, {pipeline_mode = #tpu.pipeline_mode<synchronous>, transform_indices = @transform_2, window_bounds = array<i64: 1, 1>}, {transform_indices = @transform_3, window_bounds = array<i64: 8, 1>}]} {
    %c0 = arith.constant 0 : index
    %c0_0 = arith.constant 0 : index
    %0 = vector.load %arg1[%c0, %c0_0] : memref<8x32xf32, #tpu.memory_space<vmem>>, vector<8x32xf32>
    %c0_1 = arith.constant 0 : index
    %c0_2 = arith.constant 0 : index
    %1 = vector.load %arg2[%c0_1, %c0_2] : memref<32x1xf32, #tpu.memory_space<vmem>>, vector<32x1xf32>
    %cst = arith.constant dense<0.000000e+00> : vector<8x1xf32>
    %2 = tpu.matmul %0, %1, %cst {dimension_numbers = #tpu.dot_dimension_numbers<[1], [0], [0], [1], [0, 0, 1, 1], [], []>} : vector<8x32xf32>, vector<32x1xf32>, vector<8x1xf32> -> vector<8x1xf32>
    %c0_3 = arith.constant 0 : index
    %c0_4 = arith.constant 0 : index
    %3 = vector.load %arg3[%c0_3, %c0_4] : memref<1x1xf32, #tpu.memory_space<vmem>>, vector<1x1xf32>
    %4 = vector.broadcast %3 : vector<1x1xf32> to vector<8x1xf32>
    %5 = arith.addf %2, %4 : vector<8x1xf32>
    %c0_5 = arith.constant 0 : index
    %c0_6 = arith.constant 0 : index
    %6 = vector.load %arg4[%c0_5, %c0_6] : memref<8x1xf32, #tpu.memory_space<vmem>>, vector<8x1xf32>
    tpu.vector_store %arg4[%c0_5, %c0_6], %5 {strides = array<i32>} : memref<8x1xf32, #tpu.memory_space<vmem>>, vector<8x1xf32>,
    return
  }
  func.func @transform_0(%arg0: i32) -> (i32, i32) {
    %c0_i32 = arith.constant 0 : i32
    %c0_i32_0 = arith.constant 0 : i32
    return %arg0, %c0_i32 : i32, i32
  }
  func.func @transform_1(%arg0: i32) -> (i32, i32) {
    %c0_i32 = arith.constant 0 : i32
    %c0_i32_0 = arith.constant 0 : i32
    %c0_i32_1 = arith.constant 0 : i32
    return %c0_i32, %c0_i32_0 : i32, i32
  }
  func.func @transform_2(%arg0: i32) -> (i32, i32) {
    %c0_i32 = arith.constant 0 : i32
    %c0_i32_0 = arith.constant 0 : i32
    %c0_i32_1 = arith.constant 0 : i32
    return %c0_i32, %c0_i32_0 : i32, i32
  }
  func.func @transform_3(%arg0: i32) -> (i32, i32) {
    %c0_i32 = arith.constant 0 : i32
    %c0_i32_0 = arith.constant 0 : i32
    return %arg0, %c0_i32 : i32, i32
  }
}

</mosaic_0001>

<bundles_post_ra>
// kernel: tpu_custom_call.1
= control target key start
LH: loop header
LB: loop body
LE: loop exit
PB: predicated region body
PF: predicated region fallthrough
CT: control target
= control target key end

     0   :  { %v128_v0 = vmov 0.0   ;;  %vm129_vm0 = vmmov 0   ;;  %vm28_vm1 = vcmask 261120   ;;  %vm102_vm2 = vcmask 7168   ;;  %s171_s1 = inlined_call_operand.vmem [shape: f32[32,1], index: 1, kind: input, shape index: {}]   ;;  %s172_s2 = inlined_call_operand.<no memory space> [shape: f32[1,1], index: 2, kind: input, shape index: {}]   ;;  %s173_s0 = inlined_call_operand.vmem [shape: f32[8,32], index: 0, kind: input, shape index: {}]   ;;  %s174_s3 = inlined_call_operand.vmem [shape: f32[8,1], index: 3, kind: output, shape index: {}]  }
   0x1   :  { %115 = vmatprep.subr.mxu0 %v128_v0  ;;  %v20_v1 = vld [vmem:[%s171_s1 + $0x18] sm:$0xff]  ;;  %v19_v2 = vld [vmem:[%s171_s1 + $0x10] sm:$0xff]  ;;  %123 = vmatprep.mubr.msk.f32.mxu0 %vm129_vm0, %v128_v0  ;;  %v8_v3 = vstv %s172_s2  ;;  %v18_v4 = vld [vmem:[%s171_s1 + $0x8] sm:$0xff] }
   0x2   :  { %116 = vmatpush3.msra.mxu0 %v20_v1  ;;  %9 = vst [vmem:[#allocation2] sm:$0x1] %v8_v3  ;;  %v17_v5 = vld [vmem:[%s171_s1] sm:$0xff] }
   0x3   :  { %117 = vmatprep.subr.mxu0 %v128_v0  ;;  %v16_v6 = vld [vmem:[%s173_s0] sm:$0xff] }
   0x4   :  { %118 = vmatpush3.msra.mxu0 %v19_v2 }
   0x5   :  { %119 = vmatprep.subr.mxu0 %v128_v0 }
   0x6   :  { %120 = vmatpush3.msra.mxu0 %v18_v4 }
   0x7   :  { %121 = vmatprep.subr.mxu0 %v128_v0 }
   0x8   :  { %122 = vmatpush3.msra.mxu0 %v17_v5 }
   0x9   :  { %124 = vmatmul.mubr.msk.f32.vlgmr.msra.gmra.mxu0 %vm28_vm1, %v16_v6  ;;  %v108_v7 = vld [vmem:[#allocation2] ss:$0 sm:$0xff] }
  0xc9   :  { %v98_v8 = vpop.f32.mrf.mxu0 }
  0xca   :  { %v99_v9 = vadd.f32 %v108_v7, %v98_v8 }
  0xcb   :  { %v125_v10 = vpop.f32.mrf.mxu0 }
  0xcc   :  { %103 = vst.msk [vmem:[%s174_s3] sm:$0xff] %vm102_vm2, %v99_v9 }

</bundles_post_ra>
